<compile_context>
chip_gen: v5e
topology: v5e:2x2
jax: 0.10.0
libtpu: 0.0.40
codegen_flags: <defaults>
</compile_context>

<pallas_src>
import numpy as np
import jax
import jax.numpy as jnp
from jax import lax
from jax.experimental import pallas as pl
from jax.experimental.pallas import tpu as pltpu

_PI = float(np.pi)


def _sigmoid(x):
    # exact logistic (matches torch.sigmoid); exp runs on the EUP slot.
    return 1.0 / (1.0 + jnp.exp(-x))


def _softplus(x):
    # numerically stable softplus: max(x, 0) + log1p(exp(-|x|))
    return jnp.maximum(x, 0.0) + jnp.log1p(jnp.exp(-jnp.abs(x)))


def actor_kernel(xin_ref, p_ref, out_ref):
    # xin: (B, 16) = [ x (cols 0:8) | 1.0 (col 8) | eps (cols 9:12) | 0 pad ]
    # p:   (96, 32) = [ W1+b1 rows 0:16 | W2+b2 rows 16:56 | Whead+bhead rows 56:96 ]
    xin = xin_ref[...]
    B = xin.shape[0]
    ones8 = jnp.ones((B, 8), jnp.float32)

    # Linear(8,32): bias folded into the MXU pass via the constant-1 column
    # (rows 9..15 of the block are zero, so the eps / pad columns of xin
    # contribute nothing), then Sigmoid.
    h1 = _sigmoid(jnp.dot(xin, p_ref[0:16, :],
                          preferred_element_type=jnp.float32))

    # Linear(32,32): bias row 32 of the block (rows 33..39 zero), then Sigmoid.
    h1a = jnp.concatenate([h1, ones8], axis=1)                       # (B, 40)
    h2 = _sigmoid(jnp.dot(h1a, p_ref[16:56, :],
                          preferred_element_type=jnp.float32))

    # Fused mu/sigma heads: one (40, 32) block, cols 0:3 = mu, cols 3:6 = sigma.
    h2a = jnp.concatenate([h2, ones8], axis=1)                       # (B, 40)
    head = jnp.dot(h2a, p_ref[56:96, :],
                   preferred_element_type=jnp.float32)               # (B, 32)

    mu = head[:, 0:3]
    sigma = _softplus(head[:, 3:6]) + 1e-4

    # Normal(mu, sigma).sample() via reparameterization: mu + sigma * eps.
    eps = xin[:, 9:12]
    sample = mu + sigma * eps

    # scale = [1, pi/16, pi/2], shift = [0, pi/32, pi/4] as compile-time
    # constants (iota + selects; no extra inputs / DMAs).
    lane = lax.broadcasted_iota(jnp.int32, (1, 3), 1)
    scale = jnp.where(lane == 0, 1.0,
                      jnp.where(lane == 1, _PI / 16.0, _PI / 2.0))
    shift = jnp.where(lane == 0, 0.0, scale * 0.5)
    action = _sigmoid(sample) * scale - shift

    # single lane-contiguous output slab: one store, one writeback DMA.
    out_ref[...] = jnp.concatenate([mu, sigma, action], axis=1)      # (B, 9)


@jax.jit
def actor_forward(packed_params, x, eps):
    """packed_params: (96, 32) f32 blob; x: (B, 8) f32; eps: (B, 3) f32 ~ N(0,1).
    Returns (action, mu, sigma), each (B, 3) f32."""
    B = x.shape[0]
    xin = jnp.concatenate(
        [x, jnp.ones((B, 1), jnp.float32), eps, jnp.zeros((B, 4), jnp.float32)],
        axis=1)                                                       # (B, 16)

    vmem = pl.BlockSpec(memory_space=pltpu.MemorySpace.VMEM)
    out = pl.pallas_call(
        actor_kernel,
        out_shape=jax.ShapeDtypeStruct((B, 9), jnp.float32),
        in_specs=[vmem, vmem],
        out_specs=vmem,
    )(xin, packed_params)

    mu = out[:, 0:3]
    sigma = out[:, 3:6]
    action = out[:, 6:9]
    # TODO(synk): torch returns a Normal distribution object; here the
    # distribution is represented by its (mu, sigma) parameter tensors.
    return action, mu, sigma


def pack_actor_params(raw_params):
    """((w1,b1),(w2,b2),(wmu,bmu),(wsig,bsig)) -> one (96, 32) f32 blob.
    Done ONCE at init time, not per forward call."""
    (w1, b1), (w2, b2), (wmu, bmu), (wsig, bsig) = raw_params
    blk1 = jnp.zeros((16, 32), jnp.float32).at[0:8, :].set(w1).at[8, :].set(b1)
    blk2 = jnp.zeros((40, 32), jnp.float32).at[0:32, :].set(w2).at[32, :].set(b2)
    wh = jnp.concatenate([wmu, wsig], axis=1)                         # (32, 6)
    bh = jnp.concatenate([bmu, bsig], axis=0)                         # (6,)
    blk3 = (jnp.zeros((40, 32), jnp.float32)
            .at[0:32, 0:6].set(wh).at[32, 0:6].set(bh))
    return jnp.concatenate([blk1, blk2, blk3], axis=0)                # (96, 32)


def init_params(key):
    """Deterministic init mimicking torch.nn.Linear default U(-1/sqrt(fan_in), ...).
    Returns (raw_params, packed_blob)."""
    def linear(k, fan_in, fan_out):
        kw, kb = jax.random.split(k)
        bound = 1.0 / np.sqrt(fan_in)
        w = jax.random.uniform(kw, (fan_in, fan_out), jnp.float32, -bound, bound)
        b = jax.random.uniform(kb, (fan_out,), jnp.float32, -bound, bound)
        return w, b

    k1, k2, k3, k4 = jax.random.split(key, 4)
    raw = (linear(k1, 8, 32),     # layers[0]: Linear(8, 32)
           linear(k2, 32, 32),    # layers[2]: Linear(32, 32)
           linear(k3, 32, 3),     # mu head:   Linear(32, 3)
           linear(k4, 32, 3))     # sig head:  Linear(32, 3)
    return raw, pack_actor_params(raw)


def actor_reference(raw_params, x, eps):
    """Pure-JAX reference of the torch forward (same reparameterized sample)."""
    (w1, b1), (w2, b2), (wmu, bmu), (wsig, bsig) = raw_params
    h1 = jax.nn.sigmoid(x @ w1 + b1)
    h2 = jax.nn.sigmoid(h1 @ w2 + b2)
    mu = h2 @ wmu + bmu
    sigma = jax.nn.softplus(h2 @ wsig + bsig) + 1e-4
    sample = mu + sigma * eps
    scale = jnp.array([1.0, _PI / 16.0, _PI / 2.0], jnp.float32)
    shift = jnp.array([0.0, _PI / 32.0, _PI / 4.0], jnp.float32)
    action = jax.nn.sigmoid(sample) * scale - shift
    return action, mu, sigma


if __name__ == "__main__":
    key = jax.random.PRNGKey(0)
    k_params, k_x, k_eps = jax.random.split(key, 3)

    B = 8
    raw_params, packed = init_params(k_params)
    x = jax.random.normal(k_x, (B, 8), dtype=jnp.float32)
    eps = jax.random.normal(k_eps, (B, 3), dtype=jnp.float32)

    action, mu, sigma = jax.block_until_ready(actor_forward(packed, x, eps))

    assert action.shape == (B, 3) and mu.shape == (B, 3) and sigma.shape == (B, 3)
    assert bool(jnp.all(sigma > 0.0))
    assert bool(jnp.all(jnp.isfinite(action)))

    # correctness vs. pure-JAX reference (same eps -> same sample)
    a_ref, m_ref, s_ref = actor_reference(raw_params, x, eps)
    np.testing.assert_allclose(np.asarray(mu), np.asarray(m_ref), rtol=1e-3, atol=1e-4)
    np.testing.assert_allclose(np.asarray(sigma), np.asarray(s_ref), rtol=1e-3, atol=1e-4)
    np.testing.assert_allclose(np.asarray(action), np.asarray(a_ref), rtol=1e-3, atol=1e-4)

    print("KERNEL_OK")
</pallas_src>

<mosaic_0001>
module attributes {stable_mosaic.version = 11 : i64} {
  func.func @actor_kernel(%arg0: memref<8x16xf32, #tpu.memory_space<vmem>>, %arg1: memref<96x32xf32, #tpu.memory_space<vmem>>, %arg2: memref<8x9xf32, #tpu.memory_space<vmem>>) attributes {dimension_semantics = [], scalar_prefetch = 0 : i64, scratch_operands = 0 : i64, tpu.core_type = #tpu.core_type<tc>} {
    %c0 = arith.constant 0 : index
    %c0_0 = arith.constant 0 : index
    %0 = vector.load %arg0[%c0, %c0_0] : memref<8x16xf32, #tpu.memory_space<vmem>>, vector<8x16xf32>
    %cst = arith.constant 1.000000e+00 : f32
    %1 = vector.broadcast %cst : f32 to vector<8x8xf32>
    %c0_1 = arith.constant 0 : index
    %c0_2 = arith.constant 0 : index
    %2 = vector.load %arg1[%c0_1, %c0_2] : memref<96x32xf32, #tpu.memory_space<vmem>>, vector<16x32xf32>
    %cst_3 = arith.constant dense<0.000000e+00> : vector<8x32xf32>
    %3 = tpu.matmul %0, %2, %cst_3 {dimension_numbers = #tpu.dot_dimension_numbers<[1], [0], [0], [1], [0, 0, 1, 1], [], []>} : vector<8x16xf32>, vector<16x32xf32>, vector<8x32xf32> -> vector<8x32xf32>
    %cst_4 = arith.constant 0.000000e+00 : f32
    %4 = vector.broadcast %cst_4 : f32 to vector<8x32xf32>
    %5 = arith.subf %4, %3 : vector<8x32xf32>
    %6 = math.exp %5 : vector<8x32xf32>
    %cst_5 = arith.constant 1.000000e+00 : f32
    %7 = vector.broadcast %cst_5 : f32 to vector<8x32xf32>
    %8 = arith.addf %7, %6 : vector<8x32xf32>
    %cst_6 = arith.constant 1.000000e+00 : f32
    %9 = vector.broadcast %cst_6 : f32 to vector<8x32xf32>
    %10 = arith.divf %9, %8 : vector<8x32xf32>
    %11 = tpu.concatenate %10, %1 in 1 : vector<8x32xf32>, vector<8x8xf32> -> vector<8x40xf32>
    %c16 = arith.constant 16 : index
    %c0_7 = arith.constant 0 : index
    %12 = vector.load %arg1[%c16, %c0_7] : memref<96x32xf32, #tpu.memory_space<vmem>>, vector<40x32xf32>
    %cst_8 = arith.constant dense<0.000000e+00> : vector<8x32xf32>
    %13 = tpu.matmul %11, %12, %cst_8 {dimension_numbers = #tpu.dot_dimension_numbers<[1], [0], [0], [1], [0, 0, 1, 1], [], []>} : vector<8x40xf32>, vector<40x32xf32>, vector<8x32xf32> -> vector<8x32xf32>
    %cst_9 = arith.constant 0.000000e+00 : f32
    %14 = vector.broadcast %cst_9 : f32 to vector<8x32xf32>
    %15 = arith.subf %14, %13 : vector<8x32xf32>
    %16 = math.exp %15 : vector<8x32xf32>
    %cst_10 = arith.constant 1.000000e+00 : f32
    %17 = vector.broadcast %cst_10 : f32 to vector<8x32xf32>
    %18 = arith.addf %17, %16 : vector<8x32xf32>
    %cst_11 = arith.constant 1.000000e+00 : f32
    %19 = vector.broadcast %cst_11 : f32 to vector<8x32xf32>
    %20 = arith.divf %19, %18 : vector<8x32xf32>
    %21 = tpu.concatenate %20, %1 in 1 : vector<8x32xf32>, vector<8x8xf32> -> vector<8x40xf32>
    %c56 = arith.constant 56 : index
    %c0_12 = arith.constant 0 : index
    %22 = vector.load %arg1[%c56, %c0_12] : memref<96x32xf32, #tpu.memory_space<vmem>>, vector<40x32xf32>
    %cst_13 = arith.constant dense<0.000000e+00> : vector<8x32xf32>
    %23 = tpu.matmul %21, %22, %cst_13 {dimension_numbers = #tpu.dot_dimension_numbers<[1], [0], [0], [1], [0, 0, 1, 1], [], []>} : vector<8x40xf32>, vector<40x32xf32>, vector<8x32xf32> -> vector<8x32xf32>
    %24 = vector.extract_strided_slice %23 {offsets = [0, 0], sizes = [8, 3], strides = [1, 1]} : vector<8x32xf32> to vector<8x3xf32>
    %25 = vector.extract_strided_slice %23 {offsets = [0, 3], sizes = [8, 3], strides = [1, 1]} : vector<8x32xf32> to vector<8x3xf32>
    %cst_14 = arith.constant 0.000000e+00 : f32
    %26 = vector.broadcast %cst_14 : f32 to vector<8x3xf32>
    %27 = arith.maximumf %25, %26 : vector<8x3xf32>
    %28 = math.absf %25 : vector<8x3xf32>
    %cst_15 = arith.constant 0.000000e+00 : f32
    %29 = vector.broadcast %cst_15 : f32 to vector<8x3xf32>
    %30 = arith.subf %29, %28 : vector<8x3xf32>
    %31 = math.exp %30 : vector<8x3xf32>
    %32 = math.log1p %31 : vector<8x3xf32>
    %33 = arith.addf %27, %32 : vector<8x3xf32>
    %cst_16 = arith.constant 9.99999974E-5 : f32
    %34 = vector.broadcast %cst_16 : f32 to vector<8x3xf32>
    %35 = arith.addf %33, %34 : vector<8x3xf32>
    %36 = vector.extract_strided_slice %0 {offsets = [0, 9], sizes = [8, 3], strides = [1, 1]} : vector<8x16xf32> to vector<8x3xf32>
    %37 = arith.mulf %35, %36 : vector<8x3xf32>
    %38 = arith.addf %24, %37 : vector<8x3xf32>
    %39 = tpu.iota {dimensions = array<i32: 1>} : vector<1x3xi32>
    %c0_i32 = arith.constant 0 : i32
    %40 = vector.broadcast %c0_i32 : i32 to vector<1x3xi32>
    %41 = arith.cmpi eq, %39, %40 : vector<1x3xi32>
    %c1_i32 = arith.constant 1 : i32
    %42 = vector.broadcast %c1_i32 : i32 to vector<1x3xi32>
    %43 = arith.cmpi eq, %39, %42 : vector<1x3xi32>
    %cst_17 = arith.constant 0.196349546 : f32
    %cst_18 = arith.constant 1.57079637 : f32
    %44 = vector.broadcast %cst_17 : f32 to vector<1x3xf32>
    %45 = vector.broadcast %cst_18 : f32 to vector<1x3xf32>
    %46 = arith.select %43, %44, %45 : vector<1x3xi1>, vector<1x3xf32>
    %cst_19 = arith.constant 1.000000e+00 : f32
    %47 = vector.broadcast %cst_19 : f32 to vector<1x3xf32>
    %48 = arith.select %41, %47, %46 : vector<1x3xi1>, vector<1x3xf32>
    %c0_i32_20 = arith.constant 0 : i32
    %49 = vector.broadcast %c0_i32_20 : i32 to vector<1x3xi32>
    %50 = arith.cmpi eq, %39, %49 : vector<1x3xi32>
    %cst_21 = arith.constant 5.000000e-01 : f32
    %51 = vector.broadcast %cst_21 : f32 to vector<1x3xf32>
    %52 = arith.mulf %48, %51 : vector<1x3xf32>
    %cst_22 = arith.constant 0.000000e+00 : f32
    %53 = vector.broadcast %cst_22 : f32 to vector<1x3xf32>
    %54 = arith.select %50, %53, %52 : vector<1x3xi1>, vector<1x3xf32>
    %cst_23 = arith.constant 0.000000e+00 : f32
    %55 = vector.broadcast %cst_23 : f32 to vector<8x3xf32>
    %56 = arith.subf %55, %38 : vector<8x3xf32>
    %57 = math.exp %56 : vector<8x3xf32>
    %cst_24 = arith.constant 1.000000e+00 : f32
    %58 = vector.broadcast %cst_24 : f32 to vector<8x3xf32>
    %59 = arith.addf %58, %57 : vector<8x3xf32>
    %cst_25 = arith.constant 1.000000e+00 : f32
    %60 = vector.broadcast %cst_25 : f32 to vector<8x3xf32>
    %61 = arith.divf %60, %59 : vector<8x3xf32>
    %62 = vector.broadcast %48 : vector<1x3xf32> to vector<8x3xf32>
    %63 = arith.mulf %61, %62 : vector<8x3xf32>
    %64 = vector.broadcast %54 : vector<1x3xf32> to vector<8x3xf32>
    %65 = arith.subf %63, %64 : vector<8x3xf32>
    %66 = tpu.concatenate %24, %35, %65 in 1 : vector<8x3xf32>, vector<8x3xf32>, vector<8x3xf32> -> vector<8x9xf32>
    %c0_26 = arith.constant 0 : index
    %c0_27 = arith.constant 0 : index
    %67 = vector.load %arg2[%c0_26, %c0_27] : memref<8x9xf32, #tpu.memory_space<vmem>>, vector<8x9xf32>
    tpu.vector_store %arg2[%c0_26, %c0_27], %66 {strides = array<i32>} : memref<8x9xf32, #tpu.memory_space<vmem>>, vector<8x9xf32>,
    return
  }
}

</mosaic_0001>

<bundles_post_ra>
// kernel: actor_forward.1
= control target key start
LH: loop header
LB: loop body
LE: loop exit
PB: predicated region body
PF: predicated region fallthrough
CT: control target
= control target key end

     0   :  { %vm14_vm0 = vcmask 130048   ;;  %vm57_vm4 = vcmask 261120   ;;  %vm64_vm6 = vcmask 326656   ;;  %s227_s24 = smov 122   ;;  %s230_s7 = smov 6   ;;  %s300_s1 = inlined_call_operand.vmem [shape: f32[96,32], index: 1, kind: input, shape index: {}]   ;;  %s301_s0 = inlined_call_operand.vmem [shape: f32[8,16], index: 0, kind: input, shape index: {}]   ;;  %s302_s2 = inlined_call_operand.vmem [shape: f32[8,9], index: 2, kind: output, shape index: {}]  }
   0x1   :  { %v13_v0 = vld [vmem:[%s300_s1 + $0x8] sm:$0xff]  ;;  %v12_v1 = vld [vmem:[%s300_s1] sm:$0xff]  ;;  %v63_v3 = vld [vmem:[%s300_s1 + $0x30] sm:$0xff] }
   0x2   :  { %32 = vmatpush.msra.mxu0 %v13_v0  ;;  %v11_v2 = vld [vmem:[%s301_s0] sm:$0xff]  ;;  %v62_v4 = vld [vmem:[%s300_s1 + $0x28] sm:$0xff]  ;;  %79 = vmatpush.msra.mxu1 %v63_v3  ;;  %v60_v6 = vld [vmem:[%s300_s1 + $0x18] sm:$0xff]  ;;  %v161_v3 = vlaneseq }
   0x3   :  { %v61_v5 = vld [vmem:[%s300_s1 + $0x20] sm:$0xff]  ;;  %v59_v7 = vld [vmem:[%s300_s1 + $0x10] sm:$0xff]  ;;  %152 = vrot.lane.b32.xlu0 %v11_v2, %s227_s24  ;;  %v112_v24 = vld [vmem:[%s300_s1 + $0x58] sm:$0xff] }
   0x4   :  { %33 = vmatpush.msra.mxu0 %v12_v1  ;;  %80 = vmatpush.msra.mxu1 %v62_v4  ;;  %v111_v25 = vld [vmem:[%s300_s1 + $0x50] sm:$0xff]  ;;  %v110_v26 = vld [vmem:[%s300_s1 + $0x48] sm:$0xff]  ;;  %v109_v27 = vld [vmem:[%s300_s1 + $0x40] sm:$0xff] }
   0x5   :  { %204 = vmatmul.msk.f32.vlgmr.msra.gmra.mxu0 %vm14_vm0, %v11_v2  ;;  %127 = vmatpush.msra.mxu2 %v112_v24  ;;  %v108_v28 = vld [vmem:[%s300_s1 + $0x38] sm:$0xff]  ;;  %s228_s1 = smov 125  }
   0x6   :  { %81 = vmatpush.msra.mxu1 %v61_v5 }
   0x7   :  { %128 = vmatpush.msra.mxu2 %v111_v25 }
   0x8   :  { %82 = vmatpush.msra.mxu1 %v60_v6  ;;  %v162_v6 = vand.u32 127, %v161_v3 }
   0x9   :  { %129 = vmatpush.msra.mxu2 %v110_v26 }
   0xa   :  { %83 = vmatpush.msra.mxu1 %v59_v7  ;;  %vm164_vm12 = vcmp.eq.s32.totalorder %v162_v6, 1  ;;  %vm163_vm13 = vcmp.eq.s32.totalorder %v162_v6, 0 }
   0xb   :  { %130 = vmatpush.msra.mxu2 %v109_v27 }
   0xd   :  { %131 = vmatpush.msra.mxu2 %v108_v28 }
  0x75   :  { %v153_v60 = vpop.permute.xlu0 %152 }
  0x82   :  { %v35_v8 = vpop.f32.mrf.mxu0 }
  0x83   :  { %v38_v9 = vsub.f32 0.0, %v35_v8  ;;  %v229_v8 = vmov 1.5707964  }
  0x85   :  { %v39_v10 = vmul.f32 1.442695, %v38_v9  ;;  %v165_v9 = vsel %vm164_vm12, 0.19634955, %v229_v8 }
  0x87   :  { %211 = vpow2.f32 %v39_v10 }
  0x8d   :  { %v212_v11 = vpop.eup %211 }
  0x8e   :  { %v41_v12 = vadd.f32 1.0, %v212_v11  ;;  %v166_v11 = vsel %vm163_vm13, 1.0, %v165_v9 }
  0x90   :  { %213 = vrcp.f32 %v41_v12  ;;  %v53_v16 = vand.u32 2147483648, %v41_v12  ;;  %v51_v18 = vand.u32 2147483647, %v41_v12  ;;  %vm47_vm2 = vweird.f32 %v41_v12 }
  0x92   :  { %v54_v20 = vor.u32 1.1754944e-38, %v53_v16  ;;  %vm52_vm5 = vcmp.eq.f32.partialorder %v51_v18, 8.507059e+37  ;;  %v167_v16 = vmul.f32 0.5, %v166_v11 }
  0x96   :  { %v214_v13 = vpop.eup %213 }
  0x97   :  { %v43_v14 = vmul.f32 %v214_v13, %v41_v12  ;;  %vm48_vm1 = vweird.f32 %v214_v13 }
  0x98   :  { %vm49_vm3 = vmor %vm47_vm2, %vm48_vm1  ;;  %vm194_vm2 = vcmask 23552  }
  0x99   :  { %v44_v15 = vsub.f32 1.0, %v43_v14 }
  0x9b   :  { %v45_v17 = vmul.f32 %v214_v13, %v44_v15 }
  0x9d   :  { %v46_v19 = vadd.f32 %v214_v13, %v45_v17 }
  0x9f   :  { %v50_v21 = vsel %vm49_vm3, %v214_v13, %v46_v19  ;;  %vm196_vm3 = vcmask 48128  }
  0xa0   :  { %v55_v22 = vsel %vm52_vm5, %v54_v20, %v50_v21  ;;  %v168_v20 = vsel %vm163_vm13, 0.0, %v167_v16 }
  0xa1   :  { %v58_v23 = vsel %vm57_vm4, %v55_v22, 1.0 }
  0xa2   :  { %205 = vmatmul.msk.f32.vlgmr.msra.gmra.mxu1 %vm64_vm6, %v58_v23 }
 0x11f   :  { %v85_v29 = vpop.f32.mrf.mxu1 }
 0x120   :  { %v88_v30 = vsub.f32 0.0, %v85_v29 }
 0x122   :  { %v89_v31 = vmul.f32 1.442695, %v88_v30 }
 0x124   :  { %215 = vpow2.f32 %v89_v31 }
 0x12a   :  { %v216_v32 = vpop.eup %215 }
 0x12b   :  { %v91_v33 = vadd.f32 1.0, %v216_v32 }
 0x12d   :  { %217 = vrcp.f32 %v91_v33  ;;  %v103_v37 = vand.u32 2147483648, %v91_v33  ;;  %v101_v39 = vand.u32 2147483647, %v91_v33  ;;  %vm97_vm8 = vweird.f32 %v91_v33 }
 0x12f   :  { %v104_v41 = vor.u32 1.1754944e-38, %v103_v37  ;;  %vm102_vm10 = vcmp.eq.f32.partialorder %v101_v39, 8.507059e+37 }
 0x133   :  { %v218_v34 = vpop.eup %217 }
 0x134   :  { %v93_v35 = vmul.f32 %v218_v34, %v91_v33  ;;  %vm98_vm7 = vweird.f32 %v218_v34 }
 0x135   :  { %vm99_vm9 = vmor %vm97_vm8, %vm98_vm7 }
 0x136   :  { %v94_v36 = vsub.f32 1.0, %v93_v35 }
 0x138   :  { %v95_v38 = vmul.f32 %v218_v34, %v94_v36 }
 0x13a   :  { %v96_v40 = vadd.f32 %v218_v34, %v95_v38 }
 0x13c   :  { %v100_v42 = vsel %vm99_vm9, %v218_v34, %v96_v40 }
 0x13d   :  { %v105_v43 = vsel %vm102_vm10, %v104_v41, %v100_v42 }
 0x13e   :  { %v107_v44 = vsel %vm57_vm4, %v105_v43, 1.0  ;;  %vm198_vm4 = vcmask 72704  }
 0x13f   :  { %206 = vmatmul.msk.f32.vlgmr.msra.gmra.mxu2 %vm64_vm6, %v107_v44 }
 0x1c2   :  { %v289_v45 = vpop.f32.mrf.mxu2 }
 0x1c3   :  { %v137_v46 = vand.u32 2147483647, %v289_v45  ;;  %v136_v57 = vmax.f32 %v289_v45, 0.0 }
 0x1c5   :  { %v138_v47 = vsub.f32 0.0, %v137_v46 }
 0x1c7   :  { %v139_v48 = vmul.f32 1.442695, %v138_v47 }
 0x1c9   :  { %219 = vpow2.f32 %v139_v48 }
 0x1cf   :  { %v220_v49 = vpop.eup %219 }
 0x1d0   :  { %v141_v50 = vadd.f32 1.0, %v220_v49  ;;  %v144_v51 = vmul.f32 -0.5, %v220_v49  ;;  %v147_v53 = vand.u32 2147483647, %v220_v49 }
 0x1d2   :  { %221 = vlog2.f32 %v141_v50  ;;  %v145_v52 = vadd.f32 1.0, %v144_v51  ;;  %vm148_vm11 = vcmp.lt.f32.partialorder %v147_v53, 0.0004427343 }
 0x1d4   :  { %v146_v56 = vmul.f32 %v220_v49, %v145_v52 }
 0x1d8   :  { %v222_v54 = vpop.eup %221 }
 0x1d9   :  { %v143_v55 = vmul.f32 0.6931472, %v222_v54 }
 0x1db   :  { %v149_v58 = vsel %vm148_vm11, %v146_v56, %v143_v55 }
 0x1dc   :  { %v150_v59 = vadd.f32 %v149_v58, %v136_v57 }
 0x1de   :  { %v151_v61 = vadd.f32 0.0001, %v150_v59 }
 0x1e0   :  { %v155_v62 = vmul.f32 %v153_v60, %v151_v61  ;;  %v195_v24 = vsel %vm194_vm2, %v289_v45, %v151_v61 }
 0x1e2   :  { %157 = vrot.lane.b32.xlu0 %v155_v62, %s228_s1 }
 0x254   :  { %v158_v63 = vpop.permute.xlu0 %157 }
 0x255   :  { %v160_v0 = vadd.f32 %v158_v63, %v289_v45 }
 0x257   :  { %v169_v1 = vsub.f32 0.0, %v160_v0 }
 0x259   :  { %v170_v2 = vmul.f32 1.442695, %v169_v1 }
 0x25b   :  { %223 = vpow2.f32 %v170_v2 }
 0x261   :  { %v224_v4 = vpop.eup %223 }
 0x262   :  { %v172_v5 = vadd.f32 1.0, %v224_v4 }
 0x264   :  { %225 = vrcp.f32 %v172_v5  ;;  %v184_v13 = vand.u32 2147483648, %v172_v5  ;;  %v182_v15 = vand.u32 2147483647, %v172_v5  ;;  %vm178_vm15 = vweird.f32 %v172_v5 }
 0x266   :  { %v185_v18 = vor.u32 1.1754944e-38, %v184_v13  ;;  %vm183_vm1 = vcmp.eq.f32.partialorder %v182_v15, 8.507059e+37 }
 0x26a   :  { %v226_v7 = vpop.eup %225 }
 0x26b   :  { %v174_v10 = vmul.f32 %v226_v7, %v172_v5  ;;  %vm179_vm14 = vweird.f32 %v226_v7 }
 0x26c   :  { %vm180_vm0 = vmor %vm178_vm15, %vm179_vm14 }
 0x26d   :  { %v175_v12 = vsub.f32 1.0, %v174_v10 }
 0x26f   :  { %v176_v14 = vmul.f32 %v226_v7, %v175_v12 }
 0x271   :  { %v177_v17 = vadd.f32 %v226_v7, %v176_v14 }
 0x273   :  { %v181_v19 = vsel %vm180_vm0, %v226_v7, %v177_v17 }
 0x274   :  { %v186_v21 = vsel %vm183_vm1, %v185_v18, %v181_v19 }
 0x275   :  { %v188_v22 = vmul.f32 %v186_v21, %v166_v11 }
 0x277   :  { %v189_v23 = vsub.f32 %v188_v22, %v168_v20 }
 0x279   :  { %191 = vrot.lane.b32.xlu1 %v189_v23, %s230_s7 }
 0x2eb   :  { %v192_v25 = vpop.permute.xlu1 %191 }
 0x2ec   :  { %v197_v26 = vsel %vm196_vm3, %v195_v24, %v192_v25 }
 0x2ed   :  { %199 = vst.msk [vmem:[%s302_s2] sm:$0xff] %vm198_vm4, %v197_v26 }

</bundles_post_ra>
